<compile_context>
chip_gen: v7x
topology: tpu7x:2x2x1
jax: 0.10.0
libtpu: 0.0.40
codegen_flags: <defaults>
</compile_context>

<pallas_src>
import jax
import jax.numpy as jnp
from jax.experimental import pallas as pl
from jax.experimental.pallas import tpu as pltpu


def _add_conv1x1_kernel(a_ref, b_ref, w_ref, o_ref):
    # a_ref, b_ref: (N, Cin, H*W)   w_ref: (Cout, Cin)   o_ref: (N, Cout, H*W)
    w = w_ref[...]                                   # (Cout, Cin), loaded once
    for n in range(a_ref.shape[0]):                  # static, tiny batch (N=1)
        x = a_ref[n] + b_ref[n]                      # (Cin, H*W)  fused VPU add
        o_ref[n] = jnp.dot(                          # (Cout, H*W) on the MXU
            w, x, preferred_element_type=jnp.float32
        ).astype(o_ref.dtype)


def add_conv1x1(x109, x100, weight):
    """x109, x100: NCHW float32 [N, Cin, H, W]; weight: [Cout, Cin, 1, 1]."""
    N, Cin, H, W = x109.shape
    Cout = weight.shape[0]
    HW = H * W

    # All three reshapes below are layout-free in NCHW (no data movement).
    a = x109.reshape(N, Cin, HW)
    b = x100.reshape(N, Cin, HW)
    w = weight.reshape(Cout, Cin)

    itemsize = jnp.dtype(x109.dtype).itemsize
    flops = 2 * N * Cout * Cin * HW
    bytes_accessed = (a.size + b.size + w.size + N * Cout * HW) * itemsize

    out_flat = pl.pallas_call(
        _add_conv1x1_kernel,
        out_shape=jax.ShapeDtypeStruct((N, Cout, HW), x109.dtype),
        in_specs=[
            pl.BlockSpec(memory_space=pltpu.MemorySpace.VMEM),
            pl.BlockSpec(memory_space=pltpu.MemorySpace.VMEM),
            pl.BlockSpec(memory_space=pltpu.MemorySpace.VMEM),
        ],
        out_specs=pl.BlockSpec(memory_space=pltpu.MemorySpace.VMEM),
        cost_estimate=pl.CostEstimate(
            flops=flops, transcendentals=0, bytes_accessed=bytes_accessed
        ),
    )(a, b, w)

    # (N, Cout, H*W) -> NCHW, again a free reshape.
    return out_flat.reshape(N, Cout, H, W)


if __name__ == "__main__":
    key = jax.random.PRNGKey(0)
    k1, k2, k3 = jax.random.split(key, 3)

    # Shapes from the PyTorch module spec (already small).
    N, Cin, H, W, Cout = 1, 64, 14, 14, 384

    x109 = jax.random.normal(k1, (N, Cin, H, W), dtype=jnp.float32)
    x100 = jax.random.normal(k2, (N, Cin, H, W), dtype=jnp.float32)
    # Deterministic weight init (kaiming-like scaling for a 1x1 conv).
    weight = jax.random.normal(k3, (Cout, Cin, 1, 1), dtype=jnp.float32) * (
        1.0 / jnp.sqrt(Cin)
    )

    y = add_conv1x1(x109, x100, weight)
    jax.block_until_ready(y)

    # Reference check against plain-JAX 1x1 conv semantics (NCHW).
    ref = jnp.einsum("nchw,oc->nohw", x109 + x100, weight.reshape(Cout, Cin))
    assert y.shape == (N, Cout, H, W)
    assert jnp.allclose(y, ref, atol=1e-4, rtol=1e-4)

    print("KERNEL_OK")
</pallas_src>

<mosaic_0001>
module attributes {stable_mosaic.version = 11 : i64} {
  func.func @_add_conv1x1_kernel(%arg0: memref<1x64x196xf32, #tpu.memory_space<vmem>>, %arg1: memref<1x64x196xf32, #tpu.memory_space<vmem>>, %arg2: memref<384x64xf32, #tpu.memory_space<vmem>>, %arg3: memref<1x384x196xf32, #tpu.memory_space<vmem>>) attributes {dimension_semantics = [], scalar_prefetch = 0 : i64, scratch_operands = 0 : i64, tpu.core_type = #tpu.core_type<tc>} {
    %c0 = arith.constant 0 : index
    %c0_0 = arith.constant 0 : index
    %0 = vector.load %arg2[%c0, %c0_0] : memref<384x64xf32, #tpu.memory_space<vmem>>, vector<384x64xf32>
    %c0_1 = arith.constant 0 : index
    %c0_2 = arith.constant 0 : index
    %c0_3 = arith.constant 0 : index
    %1 = vector.load %arg0[%c0_1, %c0_2, %c0_3] : memref<1x64x196xf32, #tpu.memory_space<vmem>>, vector<1x64x196xf32>
    %2 = vector.shape_cast %1 : vector<1x64x196xf32> to vector<64x196xf32>
    %c0_4 = arith.constant 0 : index
    %c0_5 = arith.constant 0 : index
    %c0_6 = arith.constant 0 : index
    %3 = vector.load %arg1[%c0_4, %c0_5, %c0_6] : memref<1x64x196xf32, #tpu.memory_space<vmem>>, vector<1x64x196xf32>
    %4 = vector.shape_cast %3 : vector<1x64x196xf32> to vector<64x196xf32>
    %5 = arith.addf %2, %4 : vector<64x196xf32>
    %cst = arith.constant dense<0.000000e+00> : vector<384x196xf32>
    %6 = tpu.matmul %0, %5, %cst {dimension_numbers = #tpu.dot_dimension_numbers<[1], [0], [0], [1], [0, 0, 1, 1], [], []>} : vector<384x64xf32>, vector<64x196xf32>, vector<384x196xf32> -> vector<384x196xf32>
    %c0_7 = arith.constant 0 : index
    %c0_8 = arith.constant 0 : index
    %c0_9 = arith.constant 0 : index
    %7 = vector.load %arg3[%c0_7, %c0_8, %c0_9] : memref<1x384x196xf32, #tpu.memory_space<vmem>>, vector<1x384x196xf32>
    %8 = vector.shape_cast %7 : vector<1x384x196xf32> to vector<384x196xf32>
    %9 = vector.shape_cast %6 : vector<384x196xf32> to vector<1x384x196xf32>
    tpu.vector_store %arg3[%c0_7, %c0_8, %c0_9], %9 {strides = array<i32>} : memref<1x384x196xf32, #tpu.memory_space<vmem>>, vector<1x384x196xf32>,
    return
  }
}

</mosaic_0001>

<bundles_post_ra>
// kernel: tpu_custom_call.1
= control target key start
LH: loop header
LB: loop body
LE: loop exit
PB: predicated region body
PF: predicated region fallthrough
CT: control target
= control target key end

     0   :  { %v782_v3 = vmov 0.0   ;;  %vm110_vm0 = vcmask 523264   ;;  %vm609_vm1 = vcmask 556032   ;;  %s1475_s0 = inlined_call_operand.vmem [shape: f32[1,64,196], index: 0, kind: input, shape index: {}]   ;;  %s1476_s1 = inlined_call_operand.vmem [shape: f32[1,64,196], index: 1, kind: input, shape index: {}]   ;;  %s1477_s2 = inlined_call_operand.vmem [shape: f32[384,64], index: 2, kind: input, shape index: {}]   ;;  %s1478_s3 = inlined_call_operand.vmem [shape: f32[1,384,196], index: 3, kind: output, shape index: {}]  }
   0x1   :  { %v63_v0 = vld [vmem:[%s1475_s0 + $0x8] sm:$0xff]  ;;  %v65_v1 = vld [vmem:[%s1475_s0 + $0x18] sm:$0xff]  ;;  %319 = vmatprep.mubr.f32.mxu0 %v782_v3  ;;  %463 = vmatprep.mubr.f32.mxu1 %v782_v3  ;;  %v62_v6 = vld [vmem:[%s1475_s0] sm:$0xff] }
   0x2   :  { %v79_v2 = vld [vmem:[%s1476_s1 + $0x8] sm:$0xff]  ;;  %v81_v4 = vld [vmem:[%s1476_s1 + $0x18] sm:$0xff]  ;;  %v64_v7 = vld [vmem:[%s1475_s0 + $0x10] sm:$0xff] }
   0x3   :  { %v95_v5 = vadd.f32 %v79_v2, %v63_v0  ;;  %v97_v8 = vadd.f32 %v81_v4, %v65_v1  ;;  %v78_v9 = vld [vmem:[%s1476_s1] sm:$0xff]  ;;  %v80_v10 = vld [vmem:[%s1476_s1 + $0x10] sm:$0xff]  ;;  %v67_v11 = vld [vmem:[%s1475_s0 + $0x28] sm:$0xff] }
   0x4   :  { %v94_v12 = vadd.f32 %v78_v9, %v62_v6  ;;  %v96_v13 = vadd.f32 %v80_v10, %v64_v7  ;;  %v69_v14 = vld [vmem:[%s1475_s0 + $0x38] sm:$0xff]  ;;  %v83_v15 = vld [vmem:[%s1476_s1 + $0x28] sm:$0xff]  ;;  %v66_v20 = vld [vmem:[%s1475_s0 + $0x20] sm:$0xff] }
   0x5   :  { %v85_v16 = vld [vmem:[%s1476_s1 + $0x38] sm:$0xff]  ;;  %v757_v17 = vpack.c.bf16 %v97_v8, %v95_v5  ;;  %v99_v18 = vadd.f32 %v83_v15, %v67_v11  ;;  %v68_v21 = vld [vmem:[%s1475_s0 + $0x30] sm:$0xff]  ;;  %v82_v22 = vld [vmem:[%s1476_s1 + $0x20] sm:$0xff] }
   0x6   :  { %v101_v19 = vadd.f32 %v85_v16, %v69_v14  ;;  %v759_v23 = vpack.c.bf16 %v96_v13, %v94_v12  ;;  %v84_v24 = vld [vmem:[%s1476_s1 + $0x30] sm:$0xff]  ;;  %v98_v25 = vadd.f32 %v82_v22, %v66_v20  ;;  %v71_v26 = vld [vmem:[%s1475_s0 + $0x48] sm:$0xff]  ;;  %v73_v27 = vld [vmem:[%s1475_s0 + $0x58] sm:$0xff] }
   0x7   :  { %758 = vmatprep.subr.bf16.mxu0 %v757_v17  ;;  %773 = vmatprep.subr.bf16.mxu1 %v757_v17  ;;  %v100_v29 = vadd.f32 %v84_v24, %v68_v21  ;;  %v87_v30 = vld [vmem:[%s1476_s1 + $0x48] sm:$0xff]  ;;  %v89_v31 = vld [vmem:[%s1476_s1 + $0x58] sm:$0xff]  ;;  %v70_v32 = vld [vmem:[%s1475_s0 + $0x40] sm:$0xff] }
   0x8   :  { %v761_v28 = vpack.c.bf16 %v101_v19, %v99_v18  ;;  %760 = vmatpush1.bf16.msra.mxu0 %v759_v23  ;;  %777 = vmatpush1.bf16.msra.mxu1 %v759_v23  ;;  %v103_v33 = vadd.f32 %v87_v30, %v71_v26  ;;  %v105_v34 = vadd.f32 %v89_v31, %v73_v27  ;;  %v72_v35 = vld [vmem:[%s1475_s0 + $0x50] sm:$0xff]  ;;  %v86_v36 = vld [vmem:[%s1476_s1 + $0x40] sm:$0xff]  ;;  %v75_v41 = vld [vmem:[%s1475_s0 + $0x68] sm:$0xff] }
   0x9   :  { %v88_v37 = vld [vmem:[%s1476_s1 + $0x50] sm:$0xff]  ;;  %v763_v38 = vpack.c.bf16 %v100_v29, %v98_v25  ;;  %v102_v39 = vadd.f32 %v86_v36, %v70_v32  ;;  %v77_v42 = vld [vmem:[%s1475_s0 + $0x78] sm:$0xff]  ;;  %v91_v43 = vld [vmem:[%s1476_s1 + $0x68] sm:$0xff] }
   0xa   :  { %762 = vmatprep.subr.bf16.mxu0 %v761_v28  ;;  %774 = vmatprep.subr.bf16.mxu1 %v761_v28  ;;  %v104_v40 = vadd.f32 %v88_v37, %v72_v35  ;;  %v765_v44 = vpack.c.bf16 %v105_v34, %v103_v33  ;;  %v93_v45 = vld [vmem:[%s1476_s1 + $0x78] sm:$0xff]  ;;  %v107_v46 = vadd.f32 %v91_v43, %v75_v41  ;;  %v74_v47 = vld [vmem:[%s1475_s0 + $0x60] sm:$0xff]  ;;  %v76_v48 = vld [vmem:[%s1475_s0 + $0x70] sm:$0xff] }
   0xb   :  { %v109_v49 = vadd.f32 %v93_v45, %v77_v42  ;;  %v90_v50 = vld [vmem:[%s1476_s1 + $0x60] sm:$0xff]  ;;  %v92_v51 = vld [vmem:[%s1476_s1 + $0x70] sm:$0xff]  ;;  %v15_v59 = vld [vmem:[%s1477_s2 + $0x8] sm:$0xff] }
   0xc   :  { %764 = vmatpush1.bf16.msra.mxu0 %v763_v38  ;;  %778 = vmatpush1.bf16.msra.mxu1 %v763_v38  ;;  %v767_v52 = vpack.c.bf16 %v104_v40, %v102_v39  ;;  %v106_v53 = vadd.f32 %v90_v50, %v74_v47  ;;  %v108_v54 = vadd.f32 %v92_v51, %v76_v48  ;;  %v14_v57 = vld [vmem:[%s1477_s2] sm:$0xff]  ;;  %v39_v60 = vld [vmem:[%s1477_s2 + $0xc8] sm:$0xff]  ;;  %v16_v61 = vld [vmem:[%s1477_s2 + $0x10] sm:$0xff] }
   0xd   :  { %766 = vmatprep.subr.bf16.mxu0 %v765_v44  ;;  %775 = vmatprep.subr.bf16.mxu1 %v765_v44  ;;  %v769_v55 = vpack.c.bf16 %v109_v49, %v107_v46  ;;  %v38_v58 = vld [vmem:[%s1477_s2 + $0xc0] sm:$0xff]  ;;  %v40_v62 = vld [vmem:[%s1477_s2 + $0xd0] sm:$0xff]  ;;  %v17_v63 = vld [vmem:[%s1477_s2 + $0x18] sm:$0xff] }
   0xe   :  { %v771_v56 = vpack.c.bf16 %v108_v54, %v106_v53  ;;  %v41_v0 = vld [vmem:[%s1477_s2 + $0xd8] sm:$0xff]  ;;  %v18_v1 = vld [vmem:[%s1477_s2 + $0x20] sm:$0xff]  ;;  %v19_v4 = vld [vmem:[%s1477_s2 + $0x28] sm:$0xff] }
   0xf   :  { %v42_v2 = vld [vmem:[%s1477_s2 + $0xe0] sm:$0xff]  ;;  %v43_v5 = vld [vmem:[%s1477_s2 + $0xe8] sm:$0xff]  ;;  %v20_v6 = vld [vmem:[%s1477_s2 + $0x30] sm:$0xff] }
  0x10   :  { %768 = vmatpush1.bf16.msra.mxu0 %v767_v52  ;;  %779 = vmatpush1.bf16.msra.mxu1 %v767_v52  ;;  %v44_v7 = vld [vmem:[%s1477_s2 + $0xf0] sm:$0xff]  ;;  %v21_v8 = vld [vmem:[%s1477_s2 + $0x38] sm:$0xff]  ;;  %v22_v10 = vld [vmem:[%s1477_s2 + $0x40] sm:$0xff] }
  0x11   :  { %770 = vmatprep.subr.bf16.mxu0 %v769_v55  ;;  %776 = vmatprep.subr.bf16.mxu1 %v769_v55  ;;  %v45_v9 = vld [vmem:[%s1477_s2 + $0xf8] sm:$0xff]  ;;  %v46_v11 = vld [vmem:[%s1477_s2 + $0x100] sm:$0xff]  ;;  %v23_v12 = vld [vmem:[%s1477_s2 + $0x48] sm:$0xff] }
  0x12   :  { %v47_v13 = vld [vmem:[%s1477_s2 + $0x108] sm:$0xff]  ;;  %v24_v14 = vld [vmem:[%s1477_s2 + $0x50] sm:$0xff]  ;;  %v25_v16 = vld [vmem:[%s1477_s2 + $0x58] sm:$0xff] }
  0x13   :  { %v48_v15 = vld [vmem:[%s1477_s2 + $0x110] sm:$0xff]  ;;  %v49_v17 = vld [vmem:[%s1477_s2 + $0x118] sm:$0xff]  ;;  %v26_v18 = vld [vmem:[%s1477_s2 + $0x60] sm:$0xff] }
  0x14   :  { %772 = vmatpush1.bf16.msra.mxu0 %v771_v56  ;;  %780 = vmatpush1.bf16.msra.mxu1 %v771_v56  ;;  %v50_v19 = vld [vmem:[%s1477_s2 + $0x120] sm:$0xff]  ;;  %v27_v20 = vld [vmem:[%s1477_s2 + $0x68] sm:$0xff]  ;;  %v28_v22 = vld [vmem:[%s1477_s2 + $0x70] sm:$0xff] }
  0x15   :  { %v51_v21 = vld [vmem:[%s1477_s2 + $0x128] sm:$0xff]  ;;  %v52_v23 = vld [vmem:[%s1477_s2 + $0x130] sm:$0xff]  ;;  %v29_v24 = vld [vmem:[%s1477_s2 + $0x78] sm:$0xff] }
  0x16   :  { %v53_v25 = vld [vmem:[%s1477_s2 + $0x138] sm:$0xff]  ;;  %v30_v26 = vld [vmem:[%s1477_s2 + $0x80] sm:$0xff]  ;;  %v31_v28 = vld [vmem:[%s1477_s2 + $0x88] sm:$0xff] }
  0x17   :  { %709 = vmatmul.mubr.msk.f32.vlgmr.msra.gmra.mrb[0].mxu0 %vm110_vm0, %v14_v57  ;;  %733 = vmatmul.mubr.msk.f32.vlgmr.msra.gmra.mrb[0].mxu1 %vm110_vm0, %v38_v58  ;;  %v54_v27 = vld [vmem:[%s1477_s2 + $0x140] sm:$0xff]  ;;  %v55_v29 = vld [vmem:[%s1477_s2 + $0x148] sm:$0xff]  ;;  %v32_v30 = vld [vmem:[%s1477_s2 + $0x90] sm:$0xff] }
  0x18   :  { %325 = vmatprep.mubr.f32.mxu0 %v782_v3  ;;  %469 = vmatprep.mubr.f32.mxu1 %v782_v3  ;;  %v56_v31 = vld [vmem:[%s1477_s2 + $0x150] sm:$0xff]  ;;  %v33_v32 = vld [vmem:[%s1477_s2 + $0x98] sm:$0xff]  ;;  %v34_v34 = vld [vmem:[%s1477_s2 + $0xa0] sm:$0xff] }
  0x19   :  { %v57_v33 = vld [vmem:[%s1477_s2 + $0x158] sm:$0xff]  ;;  %v58_v35 = vld [vmem:[%s1477_s2 + $0x160] sm:$0xff]  ;;  %v35_v36 = vld [vmem:[%s1477_s2 + $0xa8] sm:$0xff] }
  0x1a   :  { %v59_v37 = vld [vmem:[%s1477_s2 + $0x168] sm:$0xff]  ;;  %v36_v38 = vld [vmem:[%s1477_s2 + $0xb0] sm:$0xff]  ;;  %v37_v40 = vld [vmem:[%s1477_s2 + $0xb8] sm:$0xff] }
  0x1b   :  { %710 = vmatmul.mubr.msk.f32.gmra.mrb[2].mxu0 %vm110_vm0, %v15_v59  ;;  %734 = vmatmul.mubr.msk.f32.gmra.mrb[2].mxu1 %vm110_vm0, %v39_v60  ;;  %v60_v39 = vld [vmem:[%s1477_s2 + $0x170] sm:$0xff]  ;;  %v61_v41 = vld [vmem:[%s1477_s2 + $0x178] sm:$0xff] }
  0x1c   :  { %331 = vmatprep.mubr.f32.mxu0 %v782_v3  ;;  %475 = vmatprep.mubr.f32.mxu1 %v782_v3 }
  0x1f   :  { %711 = vmatmul.mubr.msk.f32.gmra.mrb[4].mxu0 %vm110_vm0, %v16_v61  ;;  %735 = vmatmul.mubr.msk.f32.gmra.mrb[4].mxu1 %vm110_vm0, %v40_v62 }
  0x20   :  { %337 = vmatprep.mubr.f32.mxu0 %v782_v3  ;;  %481 = vmatprep.mubr.f32.mxu1 %v782_v3 }
  0x23   :  { %712 = vmatmul.mubr.msk.f32.gmra.mrb[6].mxu0 %vm110_vm0, %v17_v63  ;;  %736 = vmatmul.mubr.msk.f32.gmra.mrb[6].mxu1 %vm110_vm0, %v41_v0 }
  0x24   :  { %343 = vmatprep.mubr.f32.mxu0 %v782_v3  ;;  %487 = vmatprep.mubr.f32.mxu1 %v782_v3 }
  0x27   :  { %713 = vmatmul.mubr.msk.f32.gmra.mrb[8].mxu0 %vm110_vm0, %v18_v1  ;;  %737 = vmatmul.mubr.msk.f32.gmra.mrb[8].mxu1 %vm110_vm0, %v42_v2 }
  0x28   :  { %349 = vmatprep.mubr.f32.mxu0 %v782_v3  ;;  %493 = vmatprep.mubr.f32.mxu1 %v782_v3 }
  0x2b   :  { %714 = vmatmul.mubr.msk.f32.gmra.mrb[10].mxu0 %vm110_vm0, %v19_v4  ;;  %738 = vmatmul.mubr.msk.f32.gmra.mrb[10].mxu1 %vm110_vm0, %v43_v5 }
  0x2c   :  { %355 = vmatprep.mubr.f32.mxu0 %v782_v3  ;;  %499 = vmatprep.mubr.f32.mxu1 %v782_v3 }
  0x2f   :  { %715 = vmatmul.mubr.msk.f32.gmra.mrb[12].mxu0 %vm110_vm0, %v20_v6  ;;  %739 = vmatmul.mubr.msk.f32.gmra.mrb[12].mxu1 %vm110_vm0, %v44_v7 }
  0x30   :  { %361 = vmatprep.mubr.f32.mxu0 %v782_v3  ;;  %505 = vmatprep.mubr.f32.mxu1 %v782_v3 }
  0x33   :  { %716 = vmatmul.mubr.msk.f32.gmra.mrb[14].mxu0 %vm110_vm0, %v21_v8  ;;  %740 = vmatmul.mubr.msk.f32.gmra.mrb[14].mxu1 %vm110_vm0, %v45_v9 }
  0x34   :  { %367 = vmatprep.mubr.f32.mxu0 %v782_v3  ;;  %511 = vmatprep.mubr.f32.mxu1 %v782_v3 }
  0x37   :  { %717 = vmatmul.mubr.msk.f32.gmra.mrb[16].mxu0 %vm110_vm0, %v22_v10  ;;  %741 = vmatmul.mubr.msk.f32.gmra.mrb[16].mxu1 %vm110_vm0, %v46_v11 }
  0x38   :  { %373 = vmatprep.mubr.f32.mxu0 %v782_v3  ;;  %517 = vmatprep.mubr.f32.mxu1 %v782_v3 }
  0x3b   :  { %718 = vmatmul.mubr.msk.f32.gmra.mrb[18].mxu0 %vm110_vm0, %v23_v12  ;;  %742 = vmatmul.mubr.msk.f32.gmra.mrb[18].mxu1 %vm110_vm0, %v47_v13 }
  0x3c   :  { %379 = vmatprep.mubr.f32.mxu0 %v782_v3  ;;  %523 = vmatprep.mubr.f32.mxu1 %v782_v3 }
  0x3f   :  { %719 = vmatmul.mubr.msk.f32.gmra.mrb[20].mxu0 %vm110_vm0, %v24_v14  ;;  %743 = vmatmul.mubr.msk.f32.gmra.mrb[20].mxu1 %vm110_vm0, %v48_v15 }
  0x40   :  { %385 = vmatprep.mubr.f32.mxu0 %v782_v3  ;;  %529 = vmatprep.mubr.f32.mxu1 %v782_v3 }
  0x43   :  { %720 = vmatmul.mubr.msk.f32.gmra.mrb[22].mxu0 %vm110_vm0, %v25_v16  ;;  %744 = vmatmul.mubr.msk.f32.gmra.mrb[22].mxu1 %vm110_vm0, %v49_v17 }
  0x44   :  { %391 = vmatprep.mubr.f32.mxu0 %v782_v3  ;;  %535 = vmatprep.mubr.f32.mxu1 %v782_v3 }
  0x47   :  { %721 = vmatmul.mubr.msk.f32.gmra.mrb[24].mxu0 %vm110_vm0, %v26_v18  ;;  %745 = vmatmul.mubr.msk.f32.gmra.mrb[24].mxu1 %vm110_vm0, %v50_v19 }
  0x48   :  { %397 = vmatprep.mubr.f32.mxu0 %v782_v3  ;;  %541 = vmatprep.mubr.f32.mxu1 %v782_v3 }
  0x4b   :  { %722 = vmatmul.mubr.msk.f32.gmra.mrb[26].mxu0 %vm110_vm0, %v27_v20  ;;  %746 = vmatmul.mubr.msk.f32.gmra.mrb[26].mxu1 %vm110_vm0, %v51_v21 }
  0x4c   :  { %403 = vmatprep.mubr.f32.mxu0 %v782_v3  ;;  %547 = vmatprep.mubr.f32.mxu1 %v782_v3 }
  0x4f   :  { %723 = vmatmul.mubr.msk.f32.gmra.mrb[28].mxu0 %vm110_vm0, %v28_v22  ;;  %747 = vmatmul.mubr.msk.f32.gmra.mrb[28].mxu1 %vm110_vm0, %v52_v23 }
  0x50   :  { %409 = vmatprep.mubr.f32.mxu0 %v782_v3  ;;  %553 = vmatprep.mubr.f32.mxu1 %v782_v3 }
  0x53   :  { %724 = vmatmul.mubr.msk.f32.gmra.mrb[30].mxu0 %vm110_vm0, %v29_v24  ;;  %748 = vmatmul.mubr.msk.f32.gmra.mrb[30].mxu1 %vm110_vm0, %v53_v25 }
  0x54   :  { %415 = vmatprep.mubr.f32.mxu0 %v782_v3  ;;  %559 = vmatprep.mubr.f32.mxu1 %v782_v3 }
  0x57   :  { %725 = vmatmul.mubr.msk.f32.gmra.mrb[32].mxu0 %vm110_vm0, %v30_v26  ;;  %749 = vmatmul.mubr.msk.f32.gmra.mrb[32].mxu1 %vm110_vm0, %v54_v27 }
  0x58   :  { %421 = vmatprep.mubr.f32.mxu0 %v782_v3  ;;  %565 = vmatprep.mubr.f32.mxu1 %v782_v3 }
  0x5b   :  { %726 = vmatmul.mubr.msk.f32.gmra.mrb[34].mxu0 %vm110_vm0, %v31_v28  ;;  %750 = vmatmul.mubr.msk.f32.gmra.mrb[34].mxu1 %vm110_vm0, %v55_v29 }
  0x5c   :  { %427 = vmatprep.mubr.f32.mxu0 %v782_v3  ;;  %571 = vmatprep.mubr.f32.mxu1 %v782_v3 }
  0x5f   :  { %727 = vmatmul.mubr.msk.f32.gmra.mrb[36].mxu0 %vm110_vm0, %v32_v30  ;;  %751 = vmatmul.mubr.msk.f32.gmra.mrb[36].mxu1 %vm110_vm0, %v56_v31 }
  0x60   :  { %433 = vmatprep.mubr.f32.mxu0 %v782_v3  ;;  %577 = vmatprep.mubr.f32.mxu1 %v782_v3 }
  0x63   :  { %728 = vmatmul.mubr.msk.f32.gmra.mrb[38].mxu0 %vm110_vm0, %v33_v32  ;;  %752 = vmatmul.mubr.msk.f32.gmra.mrb[38].mxu1 %vm110_vm0, %v57_v33 }
  0x64   :  { %439 = vmatprep.mubr.f32.mxu0 %v782_v3  ;;  %583 = vmatprep.mubr.f32.mxu1 %v782_v3 }
  0x67   :  { %729 = vmatmul.mubr.msk.f32.gmra.mrb[40].mxu0 %vm110_vm0, %v34_v34  ;;  %753 = vmatmul.mubr.msk.f32.gmra.mrb[40].mxu1 %vm110_vm0, %v58_v35 }
  0x68   :  { %445 = vmatprep.mubr.f32.mxu0 %v782_v3  ;;  %589 = vmatprep.mubr.f32.mxu1 %v782_v3 }
  0x6b   :  { %730 = vmatmul.mubr.msk.f32.gmra.mrb[42].mxu0 %vm110_vm0, %v35_v36  ;;  %754 = vmatmul.mubr.msk.f32.gmra.mrb[42].mxu1 %vm110_vm0, %v59_v37 }
  0x6c   :  { %451 = vmatprep.mubr.f32.mxu0 %v782_v3  ;;  %595 = vmatprep.mubr.f32.mxu1 %v782_v3 }
  0x6f   :  { %731 = vmatmul.mubr.msk.f32.gmra.mrb[44].mxu0 %vm110_vm0, %v36_v38  ;;  %755 = vmatmul.mubr.msk.f32.gmra.mrb[44].mxu1 %vm110_vm0, %v60_v39 }
  0x70   :  { %457 = vmatprep.mubr.f32.mxu0 %v782_v3  ;;  %601 = vmatprep.mubr.f32.mxu1 %v782_v3 }
  0x73   :  { %732 = vmatmul.mubr.msk.f32.gmra.mrb[46].mxu0 %vm110_vm0, %v37_v40  ;;  %756 = vmatmul.mubr.msk.f32.gmra.mrb[46].mxu1 %vm110_vm0, %v61_v41 }
  0xea   :  { %v321_v42 = vpop.f32.mrb[0].mxu0  ;;  %v465_v43 = vpop.f32.mrb[0].mxu1 }
  0xeb   :  { %608 = vst [vmem:[%s1478_s3] sm:$0xff] %v321_v42  ;;  %657 = vst [vmem:[%s1478_s3 + $0x180] sm:$0xff] %v465_v43  ;;  %v323_v3 = vpop.f32.mrb[1].mxu0  ;;  %v467_v44 = vpop.f32.mrb[1].mxu1 }
  0xec   :  { %610 = vst.msk [vmem:[%s1478_s3 + $0x8] sm:$0xff] %vm609_vm1, %v323_v3  ;;  %658 = vst.msk [vmem:[%s1478_s3 + $0x188] sm:$0xff] %vm609_vm1, %v467_v44 }
  0xee   :  { %v327_v45 = vpop.f32.mrb[2].mxu0  ;;  %v471_v46 = vpop.f32.mrb[2].mxu1 }
  0xef   :  { %611 = vst [vmem:[%s1478_s3 + $0x10] sm:$0xff] %v327_v45  ;;  %659 = vst [vmem:[%s1478_s3 + $0x190] sm:$0xff] %v471_v46  ;;  %v329_v47 = vpop.f32.mrb[3].mxu0  ;;  %v473_v48 = vpop.f32.mrb[3].mxu1 }
  0xf0   :  { %612 = vst.msk [vmem:[%s1478_s3 + $0x18] sm:$0xff] %vm609_vm1, %v329_v47  ;;  %660 = vst.msk [vmem:[%s1478_s3 + $0x198] sm:$0xff] %vm609_vm1, %v473_v48 }
  0xf2   :  { %v333_v49 = vpop.f32.mrb[4].mxu0  ;;  %v477_v50 = vpop.f32.mrb[4].mxu1 }
  0xf3   :  { %613 = vst [vmem:[%s1478_s3 + $0x20] sm:$0xff] %v333_v49  ;;  %661 = vst [vmem:[%s1478_s3 + $0x1a0] sm:$0xff] %v477_v50  ;;  %v335_v51 = vpop.f32.mrb[5].mxu0  ;;  %v479_v52 = vpop.f32.mrb[5].mxu1 }
  0xf4   :  { %614 = vst.msk [vmem:[%s1478_s3 + $0x28] sm:$0xff] %vm609_vm1, %v335_v51  ;;  %662 = vst.msk [vmem:[%s1478_s3 + $0x1a8] sm:$0xff] %vm609_vm1, %v479_v52 }
  0xf6   :  { %v339_v53 = vpop.f32.mrb[6].mxu0  ;;  %v483_v54 = vpop.f32.mrb[6].mxu1 }
  0xf7   :  { %615 = vst [vmem:[%s1478_s3 + $0x30] sm:$0xff] %v339_v53  ;;  %663 = vst [vmem:[%s1478_s3 + $0x1b0] sm:$0xff] %v483_v54  ;;  %v341_v55 = vpop.f32.mrb[7].mxu0  ;;  %v485_v56 = vpop.f32.mrb[7].mxu1 }
  0xf8   :  { %616 = vst.msk [vmem:[%s1478_s3 + $0x38] sm:$0xff] %vm609_vm1, %v341_v55  ;;  %664 = vst.msk [vmem:[%s1478_s3 + $0x1b8] sm:$0xff] %vm609_vm1, %v485_v56 }
  0xfa   :  { %v345_v57 = vpop.f32.mrb[8].mxu0  ;;  %v489_v58 = vpop.f32.mrb[8].mxu1 }
  0xfb   :  { %617 = vst [vmem:[%s1478_s3 + $0x40] sm:$0xff] %v345_v57  ;;  %665 = vst [vmem:[%s1478_s3 + $0x1c0] sm:$0xff] %v489_v58  ;;  %v347_v59 = vpop.f32.mrb[9].mxu0  ;;  %v491_v60 = vpop.f32.mrb[9].mxu1 }
  0xfc   :  { %618 = vst.msk [vmem:[%s1478_s3 + $0x48] sm:$0xff] %vm609_vm1, %v347_v59  ;;  %666 = vst.msk [vmem:[%s1478_s3 + $0x1c8] sm:$0xff] %vm609_vm1, %v491_v60 }
  0xfe   :  { %v351_v61 = vpop.f32.mrb[10].mxu0  ;;  %v495_v62 = vpop.f32.mrb[10].mxu1 }
  0xff   :  { %619 = vst [vmem:[%s1478_s3 + $0x50] sm:$0xff] %v351_v61  ;;  %667 = vst [vmem:[%s1478_s3 + $0x1d0] sm:$0xff] %v495_v62  ;;  %v353_v63 = vpop.f32.mrb[11].mxu0  ;;  %v497_v0 = vpop.f32.mrb[11].mxu1 }
 0x100   :  { %620 = vst.msk [vmem:[%s1478_s3 + $0x58] sm:$0xff] %vm609_vm1, %v353_v63  ;;  %668 = vst.msk [vmem:[%s1478_s3 + $0x1d8] sm:$0xff] %vm609_vm1, %v497_v0 }
 0x102   :  { %v357_v1 = vpop.f32.mrb[12].mxu0  ;;  %v501_v2 = vpop.f32.mrb[12].mxu1 }
 0x103   :  { %621 = vst [vmem:[%s1478_s3 + $0x60] sm:$0xff] %v357_v1  ;;  %669 = vst [vmem:[%s1478_s3 + $0x1e0] sm:$0xff] %v501_v2  ;;  %v359_v4 = vpop.f32.mrb[13].mxu0  ;;  %v503_v5 = vpop.f32.mrb[13].mxu1 }
 0x104   :  { %622 = vst.msk [vmem:[%s1478_s3 + $0x68] sm:$0xff] %vm609_vm1, %v359_v4  ;;  %670 = vst.msk [vmem:[%s1478_s3 + $0x1e8] sm:$0xff] %vm609_vm1, %v503_v5 }
 0x106   :  { %v363_v6 = vpop.f32.mrb[14].mxu0  ;;  %v507_v7 = vpop.f32.mrb[14].mxu1 }
 0x107   :  { %623 = vst [vmem:[%s1478_s3 + $0x70] sm:$0xff] %v363_v6  ;;  %671 = vst [vmem:[%s1478_s3 + $0x1f0] sm:$0xff] %v507_v7  ;;  %v365_v8 = vpop.f32.mrb[15].mxu0  ;;  %v509_v9 = vpop.f32.mrb[15].mxu1 }
 0x108   :  { %624 = vst.msk [vmem:[%s1478_s3 + $0x78] sm:$0xff] %vm609_vm1, %v365_v8  ;;  %672 = vst.msk [vmem:[%s1478_s3 + $0x1f8] sm:$0xff] %vm609_vm1, %v509_v9 }
 0x10a   :  { %v369_v10 = vpop.f32.mrb[16].mxu0  ;;  %v513_v11 = vpop.f32.mrb[16].mxu1 }
 0x10b   :  { %625 = vst [vmem:[%s1478_s3 + $0x80] sm:$0xff] %v369_v10  ;;  %673 = vst [vmem:[%s1478_s3 + $0x200] sm:$0xff] %v513_v11  ;;  %v371_v12 = vpop.f32.mrb[17].mxu0  ;;  %v515_v13 = vpop.f32.mrb[17].mxu1 }
 0x10c   :  { %626 = vst.msk [vmem:[%s1478_s3 + $0x88] sm:$0xff] %vm609_vm1, %v371_v12  ;;  %674 = vst.msk [vmem:[%s1478_s3 + $0x208] sm:$0xff] %vm609_vm1, %v515_v13 }
 0x10e   :  { %v375_v14 = vpop.f32.mrb[18].mxu0  ;;  %v519_v15 = vpop.f32.mrb[18].mxu1 }
 0x10f   :  { %627 = vst [vmem:[%s1478_s3 + $0x90] sm:$0xff] %v375_v14  ;;  %675 = vst [vmem:[%s1478_s3 + $0x210] sm:$0xff] %v519_v15  ;;  %v377_v16 = vpop.f32.mrb[19].mxu0  ;;  %v521_v17 = vpop.f32.mrb[19].mxu1 }
 0x110   :  { %628 = vst.msk [vmem:[%s1478_s3 + $0x98] sm:$0xff] %vm609_vm1, %v377_v16  ;;  %676 = vst.msk [vmem:[%s1478_s3 + $0x218] sm:$0xff] %vm609_vm1, %v521_v17 }
 0x112   :  { %v381_v18 = vpop.f32.mrb[20].mxu0  ;;  %v525_v19 = vpop.f32.mrb[20].mxu1 }
 0x113   :  { %629 = vst [vmem:[%s1478_s3 + $0xa0] sm:$0xff] %v381_v18  ;;  %677 = vst [vmem:[%s1478_s3 + $0x220] sm:$0xff] %v525_v19  ;;  %v383_v20 = vpop.f32.mrb[21].mxu0  ;;  %v527_v21 = vpop.f32.mrb[21].mxu1 }
 0x114   :  { %630 = vst.msk [vmem:[%s1478_s3 + $0xa8] sm:$0xff] %vm609_vm1, %v383_v20  ;;  %678 = vst.msk [vmem:[%s1478_s3 + $0x228] sm:$0xff] %vm609_vm1, %v527_v21 }
 0x116   :  { %v387_v22 = vpop.f32.mrb[22].mxu0  ;;  %v531_v23 = vpop.f32.mrb[22].mxu1 }
 0x117   :  { %631 = vst [vmem:[%s1478_s3 + $0xb0] sm:$0xff] %v387_v22  ;;  %679 = vst [vmem:[%s1478_s3 + $0x230] sm:$0xff] %v531_v23  ;;  %v389_v24 = vpop.f32.mrb[23].mxu0  ;;  %v533_v25 = vpop.f32.mrb[23].mxu1 }
 0x118   :  { %632 = vst.msk [vmem:[%s1478_s3 + $0xb8] sm:$0xff] %vm609_vm1, %v389_v24  ;;  %680 = vst.msk [vmem:[%s1478_s3 + $0x238] sm:$0xff] %vm609_vm1, %v533_v25 }
 0x11a   :  { %v393_v26 = vpop.f32.mrb[24].mxu0  ;;  %v537_v27 = vpop.f32.mrb[24].mxu1 }
 0x11b   :  { %633 = vst [vmem:[%s1478_s3 + $0xc0] sm:$0xff] %v393_v26  ;;  %681 = vst [vmem:[%s1478_s3 + $0x240] sm:$0xff] %v537_v27  ;;  %v395_v28 = vpop.f32.mrb[25].mxu0  ;;  %v539_v29 = vpop.f32.mrb[25].mxu1 }
 0x11c   :  { %634 = vst.msk [vmem:[%s1478_s3 + $0xc8] sm:$0xff] %vm609_vm1, %v395_v28  ;;  %682 = vst.msk [vmem:[%s1478_s3 + $0x248] sm:$0xff] %vm609_vm1, %v539_v29 }
 0x11e   :  { %v399_v30 = vpop.f32.mrb[26].mxu0  ;;  %v543_v31 = vpop.f32.mrb[26].mxu1 }
 0x11f   :  { %635 = vst [vmem:[%s1478_s3 + $0xd0] sm:$0xff] %v399_v30  ;;  %683 = vst [vmem:[%s1478_s3 + $0x250] sm:$0xff] %v543_v31  ;;  %v401_v32 = vpop.f32.mrb[27].mxu0  ;;  %v545_v33 = vpop.f32.mrb[27].mxu1 }
 0x120   :  { %636 = vst.msk [vmem:[%s1478_s3 + $0xd8] sm:$0xff] %vm609_vm1, %v401_v32  ;;  %684 = vst.msk [vmem:[%s1478_s3 + $0x258] sm:$0xff] %vm609_vm1, %v545_v33 }
 0x122   :  { %v405_v34 = vpop.f32.mrb[28].mxu0  ;;  %v549_v35 = vpop.f32.mrb[28].mxu1 }
 0x123   :  { %637 = vst [vmem:[%s1478_s3 + $0xe0] sm:$0xff] %v405_v34  ;;  %685 = vst [vmem:[%s1478_s3 + $0x260] sm:$0xff] %v549_v35  ;;  %v407_v36 = vpop.f32.mrb[29].mxu0  ;;  %v551_v37 = vpop.f32.mrb[29].mxu1 }
 0x124   :  { %638 = vst.msk [vmem:[%s1478_s3 + $0xe8] sm:$0xff] %vm609_vm1, %v407_v36  ;;  %686 = vst.msk [vmem:[%s1478_s3 + $0x268] sm:$0xff] %vm609_vm1, %v551_v37 }
 0x126   :  { %v411_v38 = vpop.f32.mrb[30].mxu0  ;;  %v555_v39 = vpop.f32.mrb[30].mxu1 }
 0x127   :  { %639 = vst [vmem:[%s1478_s3 + $0xf0] sm:$0xff] %v411_v38  ;;  %687 = vst [vmem:[%s1478_s3 + $0x270] sm:$0xff] %v555_v39  ;;  %v413_v40 = vpop.f32.mrb[31].mxu0  ;;  %v557_v41 = vpop.f32.mrb[31].mxu1 }
 0x128   :  { %640 = vst.msk [vmem:[%s1478_s3 + $0xf8] sm:$0xff] %vm609_vm1, %v413_v40  ;;  %688 = vst.msk [vmem:[%s1478_s3 + $0x278] sm:$0xff] %vm609_vm1, %v557_v41 }
 0x12a   :  { %v417_v42 = vpop.f32.mrb[32].mxu0  ;;  %v561_v43 = vpop.f32.mrb[32].mxu1 }
 0x12b   :  { %641 = vst [vmem:[%s1478_s3 + $0x100] sm:$0xff] %v417_v42  ;;  %689 = vst [vmem:[%s1478_s3 + $0x280] sm:$0xff] %v561_v43  ;;  %v419_v3 = vpop.f32.mrb[33].mxu0  ;;  %v563_v44 = vpop.f32.mrb[33].mxu1 }
 0x12c   :  { %642 = vst.msk [vmem:[%s1478_s3 + $0x108] sm:$0xff] %vm609_vm1, %v419_v3  ;;  %690 = vst.msk [vmem:[%s1478_s3 + $0x288] sm:$0xff] %vm609_vm1, %v563_v44 }
 0x12e   :  { %v423_v45 = vpop.f32.mrb[34].mxu0  ;;  %v567_v46 = vpop.f32.mrb[34].mxu1 }
 0x12f   :  { %643 = vst [vmem:[%s1478_s3 + $0x110] sm:$0xff] %v423_v45  ;;  %691 = vst [vmem:[%s1478_s3 + $0x290] sm:$0xff] %v567_v46  ;;  %v425_v47 = vpop.f32.mrb[35].mxu0  ;;  %v569_v48 = vpop.f32.mrb[35].mxu1 }
 0x130   :  { %644 = vst.msk [vmem:[%s1478_s3 + $0x118] sm:$0xff] %vm609_vm1, %v425_v47  ;;  %692 = vst.msk [vmem:[%s1478_s3 + $0x298] sm:$0xff] %vm609_vm1, %v569_v48 }
 0x132   :  { %v429_v49 = vpop.f32.mrb[36].mxu0  ;;  %v573_v50 = vpop.f32.mrb[36].mxu1 }
 0x133   :  { %645 = vst [vmem:[%s1478_s3 + $0x120] sm:$0xff] %v429_v49  ;;  %693 = vst [vmem:[%s1478_s3 + $0x2a0] sm:$0xff] %v573_v50  ;;  %v431_v51 = vpop.f32.mrb[37].mxu0  ;;  %v575_v52 = vpop.f32.mrb[37].mxu1 }
 0x134   :  { %646 = vst.msk [vmem:[%s1478_s3 + $0x128] sm:$0xff] %vm609_vm1, %v431_v51  ;;  %694 = vst.msk [vmem:[%s1478_s3 + $0x2a8] sm:$0xff] %vm609_vm1, %v575_v52 }
 0x136   :  { %v435_v53 = vpop.f32.mrb[38].mxu0  ;;  %v579_v54 = vpop.f32.mrb[38].mxu1 }
 0x137   :  { %647 = vst [vmem:[%s1478_s3 + $0x130] sm:$0xff] %v435_v53  ;;  %695 = vst [vmem:[%s1478_s3 + $0x2b0] sm:$0xff] %v579_v54  ;;  %v437_v55 = vpop.f32.mrb[39].mxu0  ;;  %v581_v56 = vpop.f32.mrb[39].mxu1 }
 0x138   :  { %648 = vst.msk [vmem:[%s1478_s3 + $0x138] sm:$0xff] %vm609_vm1, %v437_v55  ;;  %696 = vst.msk [vmem:[%s1478_s3 + $0x2b8] sm:$0xff] %vm609_vm1, %v581_v56 }
 0x13a   :  { %v441_v57 = vpop.f32.mrb[40].mxu0  ;;  %v585_v58 = vpop.f32.mrb[40].mxu1 }
 0x13b   :  { %649 = vst [vmem:[%s1478_s3 + $0x140] sm:$0xff] %v441_v57  ;;  %697 = vst [vmem:[%s1478_s3 + $0x2c0] sm:$0xff] %v585_v58  ;;  %v443_v59 = vpop.f32.mrb[41].mxu0  ;;  %v587_v60 = vpop.f32.mrb[41].mxu1 }
 0x13c   :  { %650 = vst.msk [vmem:[%s1478_s3 + $0x148] sm:$0xff] %vm609_vm1, %v443_v59  ;;  %698 = vst.msk [vmem:[%s1478_s3 + $0x2c8] sm:$0xff] %vm609_vm1, %v587_v60 }
 0x13e   :  { %v447_v61 = vpop.f32.mrb[42].mxu0  ;;  %v591_v62 = vpop.f32.mrb[42].mxu1 }
 0x13f   :  { %651 = vst [vmem:[%s1478_s3 + $0x150] sm:$0xff] %v447_v61  ;;  %699 = vst [vmem:[%s1478_s3 + $0x2d0] sm:$0xff] %v591_v62  ;;  %v449_v63 = vpop.f32.mrb[43].mxu0  ;;  %v593_v0 = vpop.f32.mrb[43].mxu1 }
 0x140   :  { %652 = vst.msk [vmem:[%s1478_s3 + $0x158] sm:$0xff] %vm609_vm1, %v449_v63  ;;  %700 = vst.msk [vmem:[%s1478_s3 + $0x2d8] sm:$0xff] %vm609_vm1, %v593_v0 }
 0x142   :  { %v453_v1 = vpop.f32.mrb[44].mxu0  ;;  %v597_v2 = vpop.f32.mrb[44].mxu1 }
 0x143   :  { %653 = vst [vmem:[%s1478_s3 + $0x160] sm:$0xff] %v453_v1  ;;  %701 = vst [vmem:[%s1478_s3 + $0x2e0] sm:$0xff] %v597_v2  ;;  %v455_v4 = vpop.f32.mrb[45].mxu0  ;;  %v599_v5 = vpop.f32.mrb[45].mxu1 }
 0x144   :  { %654 = vst.msk [vmem:[%s1478_s3 + $0x168] sm:$0xff] %vm609_vm1, %v455_v4  ;;  %702 = vst.msk [vmem:[%s1478_s3 + $0x2e8] sm:$0xff] %vm609_vm1, %v599_v5 }
 0x146   :  { %v459_v6 = vpop.f32.mrb[46].mxu0  ;;  %v603_v7 = vpop.f32.mrb[46].mxu1 }
 0x147   :  { %655 = vst [vmem:[%s1478_s3 + $0x170] sm:$0xff] %v459_v6  ;;  %703 = vst [vmem:[%s1478_s3 + $0x2f0] sm:$0xff] %v603_v7  ;;  %v461_v8 = vpop.f32.mrb[47].mxu0  ;;  %v605_v9 = vpop.f32.mrb[47].mxu1 }
 0x148   :  { %656 = vst.msk [vmem:[%s1478_s3 + $0x178] sm:$0xff] %vm609_vm1, %v461_v8  ;;  %704 = vst.msk [vmem:[%s1478_s3 + $0x2f8] sm:$0xff] %vm609_vm1, %v605_v9 }

</bundles_post_ra>
